<compile_context>
chip_gen: v6e
topology: v6e:2x2x1
jax: 0.10.0
libtpu: 0.0.40
codegen_flags: <defaults>
</compile_context>

<pallas_src>
import functools

import jax
import jax.numpy as jnp
from jax.experimental import pallas as pl
from jax.experimental.pallas import tpu as pltpu


def mlp_prompt_kernel(ptid_ref,                    # VMEM, (N, 1) int32  — prompt token ids (or pre-mapped rows)
                      iid_ref,                     # VMEM, (1, L) int32  — registered prompt vocab ids
                      table_ref,                   # VMEM, (L, E)        — embedding table
                      w1_ref, b1_ref,              # VMEM, (E, H), (1, H)
                      w2_ref, b2_ref,              # VMEM, (H, E), (1, E)
                      out_ref,                     # VMEM, (N, E)
                      *, do_map: bool):
    N = out_ref.shape[0]
    L = table_ref.shape[0]

    ids = ptid_ref[...]                                            # (N, 1) int32
    col = jax.lax.broadcasted_iota(jnp.int32, (N, L), 1)           # (N, L)

    if do_map:
        # torch: (ids.view(-1,1) == input_ids).int().argmax(dim=1)
        # == first matching column; if no match, argmax of all-zeros -> 0.
        eq = ids == iid_ref[...]                                   # (N, L) bool, VPU compare
        first = jnp.min(jnp.where(eq, col, L), axis=1, keepdims=True)
        mapped = jnp.where(first == L, 0, first)                   # (N, 1) int32
    else:
        mapped = ids                                               # already local rows

    # Embedding gather as a one-hot matmul on the MXU (no dynamic row loads).
    one_hot = (mapped == col).astype(table_ref.dtype)              # (N, L)
    embs = jnp.dot(one_hot, table_ref[...],
                   preferred_element_type=jnp.float32)             # (N, E) f32

    # MLP: Linear(E,H) -> ReLU -> Linear(H,E); f32 accumulate throughout.
    h = jnp.dot(embs, w1_ref[...], preferred_element_type=jnp.float32) + b1_ref[...]
    h = jnp.maximum(h, 0.0)
    y = jnp.dot(h, w2_ref[...], preferred_element_type=jnp.float32) + b2_ref[...]
    out_ref[...] = y.astype(out_ref.dtype)


def mlp_prompt_encoder_forward(prompt_token_ids, input_ids, emb_table,
                               w1, b1, w2, b2, id_offset=0):
    """Pallas implementation of MLPPromptEncoder.forward (num_layers=1)."""
    N = prompt_token_ids.shape[0]
    L, E = emb_table.shape
    H = w1.shape[1]

    do_map = (id_offset == 0)
    if do_map:
        ptids = prompt_token_ids.astype(jnp.int32).reshape(N, 1)
    else:
        ptids = (prompt_token_ids.astype(jnp.int32) - jnp.int32(id_offset)).reshape(N, 1)
    iids = input_ids.astype(jnp.int32).reshape(1, L)

    kernel = functools.partial(mlp_prompt_kernel, do_map=do_map)

    out = pl.pallas_call(
        kernel,
        out_shape=jax.ShapeDtypeStruct((N, E), emb_table.dtype),
        grid=(1,),
        in_specs=[
            pl.BlockSpec((N, 1), lambda i: (0, 0)),    # prompt token ids
            pl.BlockSpec((1, L), lambda i: (0, 0)),    # registered input ids
            pl.BlockSpec((L, E), lambda i: (0, 0)),    # embedding table
            pl.BlockSpec((E, H), lambda i: (0, 0)),    # W1 (in, out)
            pl.BlockSpec((1, H), lambda i: (0, 0)),    # b1
            pl.BlockSpec((H, E), lambda i: (0, 0)),    # W2 (in, out)
            pl.BlockSpec((1, E), lambda i: (0, 0)),    # b2
        ],
        out_specs=pl.BlockSpec((N, E), lambda i: (0, 0)),
        compiler_params=pltpu.CompilerParams(
            dimension_semantics=("arbitrary",),
            vmem_limit_bytes=8 << 20,
        ),
    )(ptids, iids, emb_table, w1, b1.reshape(1, H), w2, b2.reshape(1, E))
    return out


def _reference_forward(prompt_token_ids, input_ids, emb_table, w1, b1, w2, b2, id_offset=0):
    if id_offset > 0:
        mapped = prompt_token_ids - id_offset
    else:
        eq = (prompt_token_ids.reshape(-1, 1) == input_ids).astype(jnp.int32)
        mapped = jnp.argmax(eq, axis=1)
    embs = jnp.take(emb_table, mapped, axis=0)
    h = jnp.maximum(embs @ w1 + b1, 0.0)
    return h @ w2 + b2


if __name__ == "__main__":
    # Module config (small, consistent with the forward):
    #   length = 8 prompt tokens, embedding_dim = 32, hidden_size = 32,
    #   num_layers = 1, id_offset = 0 (exercises the in-kernel argmax mapping).
    length, E, H = 8, 32, 32

    key = jax.random.PRNGKey(0)
    k_tab, k_w1, k_b1, k_w2, k_b2, k_perm = jax.random.split(key, 6)

    # torch.nn.Embedding default init ~ N(0,1); Linear default ~ U(-1/sqrt(fan_in), 1/sqrt(fan_in)).
    emb_table = jax.random.normal(k_tab, (length, E), dtype=jnp.float32)
    w1 = jax.random.uniform(k_w1, (E, H), jnp.float32, -1.0 / jnp.sqrt(E), 1.0 / jnp.sqrt(E))
    b1 = jax.random.uniform(k_b1, (H,), jnp.float32, -1.0 / jnp.sqrt(E), 1.0 / jnp.sqrt(E))
    w2 = jax.random.uniform(k_w2, (H, E), jnp.float32, -1.0 / jnp.sqrt(H), 1.0 / jnp.sqrt(H))
    b2 = jax.random.uniform(k_b2, (E,), jnp.float32, -1.0 / jnp.sqrt(H), 1.0 / jnp.sqrt(H))

    # prompt_ids are arbitrary vocab ids registered with the encoder.
    input_ids = jnp.arange(100, 100 + length, dtype=jnp.int32)           # self.input_ids
    # The batch of prompt token ids seen at forward time (a permutation of prompt_ids).
    perm = jax.random.permutation(k_perm, length)
    prompt_token_ids = input_ids[perm]                                   # shape (8,)

    # --- id_offset == 0 path (argmax mapping fused in-kernel) ---
    out = mlp_prompt_encoder_forward(prompt_token_ids, input_ids, emb_table,
                                     w1, b1, w2, b2, id_offset=0)
    out = jax.block_until_ready(out)
    ref = _reference_forward(prompt_token_ids, input_ids, emb_table, w1, b1, w2, b2, id_offset=0)
    assert out.shape == (length, E)
    assert jnp.allclose(out, ref, atol=1e-5, rtol=1e-5), "mismatch vs reference (id_offset=0)"

    # --- id_offset > 0 path (simple subtraction mapping) ---
    offset = 100
    out2 = mlp_prompt_encoder_forward(input_ids, input_ids, emb_table,
                                      w1, b1, w2, b2, id_offset=offset)
    out2 = jax.block_until_ready(out2)
    ref2 = _reference_forward(input_ids, input_ids, emb_table, w1, b1, w2, b2, id_offset=offset)
    assert jnp.allclose(out2, ref2, atol=1e-5, rtol=1e-5), "mismatch vs reference (id_offset>0)"

    print("KERNEL_OK")
</pallas_src>

<mosaic_0001>
module attributes {stable_mosaic.version = 11 : i64} {
  func.func @mlp_prompt_kernel(%arg0: i32, %arg1: memref<8x1xi32, #tpu.memory_space<vmem>>, %arg2: memref<1x8xi32, #tpu.memory_space<vmem>>, %arg3: memref<8x32xf32, #tpu.memory_space<vmem>>, %arg4: memref<32x32xf32, #tpu.memory_space<vmem>>, %arg5: memref<1x32xf32, #tpu.memory_space<vmem>>, %arg6: memref<32x32xf32, #tpu.memory_space<vmem>>, %arg7: memref<1x32xf32, #tpu.memory_space<vmem>>, %arg8: memref<8x32xf32, #tpu.memory_space<vmem>>) attributes {dimension_semantics = [#tpu.dimension_semantics<arbitrary>], iteration_bounds = array<i64: 1>, scalar_prefetch = 0 : i64, scratch_operands = 0 : i64, tpu.core_type = #tpu.core_type<tc>, window_params = [{pipeline_mode = #tpu.pipeline_mode<synchronous>, transform_indices = @transform_0, window_bounds = array<i64: 8, 1>}, {pipeline_mode = #tpu.pipeline_mode<synchronous>, transform_indices = @transform_1, window_bounds = array<i64: 1, 8>}, {pipeline_mode = #tpu.pipeline_mode<synchronous>, transform_indices = @transform_2, window_bounds = array<i64: 8, 32>}, {pipeline_mode = #tpu.pipeline_mode<synchronous>, transform_indices = @transform_3, window_bounds = array<i64: 32, 32>}, {pipeline_mode = #tpu.pipeline_mode<synchronous>, transform_indices = @transform_4, window_bounds = array<i64: 1, 32>}, {pipeline_mode = #tpu.pipeline_mode<synchronous>, transform_indices = @transform_5, window_bounds = array<i64: 32, 32>}, {pipeline_mode = #tpu.pipeline_mode<synchronous>, transform_indices = @transform_6, window_bounds = array<i64: 1, 32>}, {pipeline_mode = #tpu.pipeline_mode<synchronous>, transform_indices = @transform_7, window_bounds = array<i64: 8, 32>}]} {
    %c0 = arith.constant 0 : index
    %c0_0 = arith.constant 0 : index
    %0 = vector.load %arg1[%c0, %c0_0] : memref<8x1xi32, #tpu.memory_space<vmem>>, vector<8x1xi32>
    %1 = tpu.iota {dimensions = array<i32: 1>} : vector<8x8xi32>
    %c0_1 = arith.constant 0 : index
    %c0_2 = arith.constant 0 : index
    %2 = vector.load %arg2[%c0_1, %c0_2] : memref<1x8xi32, #tpu.memory_space<vmem>>, vector<1x8xi32>
    %3 = vector.broadcast %0 : vector<8x1xi32> to vector<8x8xi32>
    %4 = vector.broadcast %2 : vector<1x8xi32> to vector<8x8xi32>
    %5 = arith.cmpi eq, %3, %4 : vector<8x8xi32>
    %c8_i32 = arith.constant 8 : i32
    %6 = vector.broadcast %c8_i32 : i32 to vector<8x8xi32>
    %7 = arith.select %5, %1, %6 : vector<8x8xi1>, vector<8x8xi32>
    %cst = arith.constant dense<2147483647> : vector<8xi32>
    %8 = vector.multi_reduction <minsi>, %7, %cst [1] : vector<8x8xi32> to vector<8xi32>
    %9 = vector.shape_cast %8 : vector<8xi32> to vector<8x1xi32>
    %c8_i32_3 = arith.constant 8 : i32
    %10 = vector.broadcast %c8_i32_3 : i32 to vector<8x1xi32>
    %11 = arith.cmpi eq, %9, %10 : vector<8x1xi32>
    %c0_i32 = arith.constant 0 : i32
    %12 = vector.broadcast %c0_i32 : i32 to vector<8x1xi32>
    %13 = arith.select %11, %12, %9 : vector<8x1xi1>, vector<8x1xi32>
    %14 = vector.broadcast %13 : vector<8x1xi32> to vector<8x8xi32>
    %15 = arith.cmpi eq, %14, %1 : vector<8x8xi32>
    %16 = arith.extui %15 : vector<8x8xi1> to vector<8x8xi32>
    %17 = arith.sitofp %16 : vector<8x8xi32> to vector<8x8xf32>
    %c0_4 = arith.constant 0 : index
    %c0_5 = arith.constant 0 : index
    %18 = vector.load %arg3[%c0_4, %c0_5] : memref<8x32xf32, #tpu.memory_space<vmem>>, vector<8x32xf32>
    %cst_6 = arith.constant dense<0.000000e+00> : vector<8x32xf32>
    %19 = tpu.matmul %17, %18, %cst_6 {dimension_numbers = #tpu.dot_dimension_numbers<[1], [0], [0], [1], [0, 0, 1, 1], [], []>} : vector<8x8xf32>, vector<8x32xf32>, vector<8x32xf32> -> vector<8x32xf32>
    %c0_7 = arith.constant 0 : index
    %c0_8 = arith.constant 0 : index
    %20 = vector.load %arg4[%c0_7, %c0_8] : memref<32x32xf32, #tpu.memory_space<vmem>>, vector<32x32xf32>
    %cst_9 = arith.constant dense<0.000000e+00> : vector<8x32xf32>
    %21 = tpu.matmul %19, %20, %cst_9 {dimension_numbers = #tpu.dot_dimension_numbers<[1], [0], [0], [1], [0, 0, 1, 1], [], []>} : vector<8x32xf32>, vector<32x32xf32>, vector<8x32xf32> -> vector<8x32xf32>
    %c0_10 = arith.constant 0 : index
    %c0_11 = arith.constant 0 : index
    %22 = vector.load %arg5[%c0_10, %c0_11] : memref<1x32xf32, #tpu.memory_space<vmem>>, vector<1x32xf32>
    %23 = vector.broadcast %22 : vector<1x32xf32> to vector<8x32xf32>
    %24 = arith.addf %21, %23 : vector<8x32xf32>
    %cst_12 = arith.constant 0.000000e+00 : f32
    %25 = vector.broadcast %cst_12 : f32 to vector<8x32xf32>
    %26 = arith.maximumf %24, %25 : vector<8x32xf32>
    %c0_13 = arith.constant 0 : index
    %c0_14 = arith.constant 0 : index
    %27 = vector.load %arg6[%c0_13, %c0_14] : memref<32x32xf32, #tpu.memory_space<vmem>>, vector<32x32xf32>
    %cst_15 = arith.constant dense<0.000000e+00> : vector<8x32xf32>
    %28 = tpu.matmul %26, %27, %cst_15 {dimension_numbers = #tpu.dot_dimension_numbers<[1], [0], [0], [1], [0, 0, 1, 1], [], []>} : vector<8x32xf32>, vector<32x32xf32>, vector<8x32xf32> -> vector<8x32xf32>
    %c0_16 = arith.constant 0 : index
    %c0_17 = arith.constant 0 : index
    %29 = vector.load %arg7[%c0_16, %c0_17] : memref<1x32xf32, #tpu.memory_space<vmem>>, vector<1x32xf32>
    %30 = vector.broadcast %29 : vector<1x32xf32> to vector<8x32xf32>
    %31 = arith.addf %28, %30 : vector<8x32xf32>
    %c0_18 = arith.constant 0 : index
    %c0_19 = arith.constant 0 : index
    %32 = vector.load %arg8[%c0_18, %c0_19] : memref<8x32xf32, #tpu.memory_space<vmem>>, vector<8x32xf32>
    tpu.vector_store %arg8[%c0_18, %c0_19], %31 {strides = array<i32>} : memref<8x32xf32, #tpu.memory_space<vmem>>, vector<8x32xf32>,
    return
  }
  func.func @transform_0(%arg0: i32) -> (i32, i32) {
    %c0_i32 = arith.constant 0 : i32
    %c0_i32_0 = arith.constant 0 : i32
    %c0_i32_1 = arith.constant 0 : i32
    return %c0_i32, %c0_i32_0 : i32, i32
  }
  func.func @transform_1(%arg0: i32) -> (i32, i32) {
    %c0_i32 = arith.constant 0 : i32
    %c0_i32_0 = arith.constant 0 : i32
    %c0_i32_1 = arith.constant 0 : i32
    return %c0_i32, %c0_i32_0 : i32, i32
  }
  func.func @transform_2(%arg0: i32) -> (i32, i32) {
    %c0_i32 = arith.constant 0 : i32
    %c0_i32_0 = arith.constant 0 : i32
    %c0_i32_1 = arith.constant 0 : i32
    return %c0_i32, %c0_i32_0 : i32, i32
  }
  func.func @transform_3(%arg0: i32) -> (i32, i32) {
    %c0_i32 = arith.constant 0 : i32
    %c0_i32_0 = arith.constant 0 : i32
    %c0_i32_1 = arith.constant 0 : i32
    return %c0_i32, %c0_i32_0 : i32, i32
  }
  func.func @transform_4(%arg0: i32) -> (i32, i32) {
    %c0_i32 = arith.constant 0 : i32
    %c0_i32_0 = arith.constant 0 : i32
    %c0_i32_1 = arith.constant 0 : i32
    return %c0_i32, %c0_i32_0 : i32, i32
  }
  func.func @transform_5(%arg0: i32) -> (i32, i32) {
    %c0_i32 = arith.constant 0 : i32
    %c0_i32_0 = arith.constant 0 : i32
    %c0_i32_1 = arith.constant 0 : i32
    return %c0_i32, %c0_i32_0 : i32, i32
  }
  func.func @transform_6(%arg0: i32) -> (i32, i32) {
    %c0_i32 = arith.constant 0 : i32
    %c0_i32_0 = arith.constant 0 : i32
    %c0_i32_1 = arith.constant 0 : i32
    return %c0_i32, %c0_i32_0 : i32, i32
  }
  func.func @transform_7(%arg0: i32) -> (i32, i32) {
    %c0_i32 = arith.constant 0 : i32
    %c0_i32_0 = arith.constant 0 : i32
    %c0_i32_1 = arith.constant 0 : i32
    return %c0_i32, %c0_i32_0 : i32, i32
  }
}

</mosaic_0001>

<bundles_post_ra>
// kernel: tpu_custom_call.1
= control target key start
LH: loop header
LB: loop body
LE: loop exit
PB: predicated region body
PF: predicated region fallthrough
CT: control target
= control target key end

     0   :  { %12 = vsyncpa [#allocation3], 0  ;;  %s551_s0 = inlined_call_operand.vmem [shape: s32[8,1], index: 0, kind: input, shape index: {}]   ;;  %s552_s1 = inlined_call_operand.vmem [shape: s32[1,8], index: 1, kind: input, shape index: {}]   ;;  %s553_s2 = inlined_call_operand.vmem [shape: f32[8,32], index: 2, kind: input, shape index: {}]   ;;  %s554_s3 = inlined_call_operand.hbm [shape: f32[32,32], index: 3, kind: input, shape index: {}]   ;;  %s555_s4 = inlined_call_operand.vmem [shape: f32[1,32], index: 4, kind: input, shape index: {}]   ;;  %s556_s5 = inlined_call_operand.hbm [shape: f32[32,32], index: 5, kind: input, shape index: {}]   ;;  %s557_s6 = inlined_call_operand.vmem [shape: f32[1,32], index: 6, kind: input, shape index: {}]   ;;  %s558_s7 = inlined_call_operand.hbm [shape: f32[8,32], index: 7, kind: output, shape index: {}]  }
   0x1   :  { %13 = vsyncpa [#allocation6], 0 }
   0x2   :  { %14 = vsyncpa [#allocation4], 0  ;;  %s471_s24 = smov [#allocation2]  }
   0x3   :  { %s26_s25 = sshll.u32 %s471_s24, 4  ;;  %s27_s25 = int_to_ptr.vmem [resolvable:$true] %s26_s25 }
   0x4   :  { %s413_s26 = scalar_lea.vmem %s27_s25, 512  ;;  %p418_p1 = scmp.lt.s32.totalorder %s27_s25, %s27_s25 }
   0x5   :  { %p414_p0 = scmp.ne.s32.totalorder %s27_s25, %s413_s26  ;;  %p419_p2 = scmp.lt.s32.totalorder %s413_s26, %s413_s26 }
   0x7   :  { %p420_p3 = por %p419_p2, %p418_p1 }
   0x9   :  { %p421_p4 = pnand %p420_p3, %p414_p0 }
   0xb   :  { %424 = shalt.err (!%p421_p4)
}
   0xc   :  { %s472_s27 = smov 128   ;;  %s473_s28 = smov 8  }
   0xd   :  { %32 = dma.hbm_to_vmem [thread:$0]  %s554_s3, 512, %s27_s25, [#allocation3], %s472_s27, %s472_s27, %s473_s28  }
   0xe   :  { %s474_s8 = smov [#allocation5]  }
   0xf   :  { %s40_s9 = sshll.u32 %s474_s8, 4  ;;  %s41_s9 = int_to_ptr.vmem [resolvable:$true] %s40_s9 }
  0x10   :  { %s433_s10 = scalar_lea.vmem %s41_s9, 512  ;;  %p438_p6 = scmp.lt.s32.totalorder %s41_s9, %s41_s9 }
  0x11   :  { %p434_p5 = scmp.ne.s32.totalorder %s41_s9, %s433_s10  ;;  %p439_p7 = scmp.lt.s32.totalorder %s433_s10, %s433_s10 }
  0x13   :  { %p440_p8 = por %p439_p7, %p438_p6 }
  0x15   :  { %p441_p9 = pnand %p440_p8, %p434_p5 }
  0x17   :  { %444 = shalt.err (!%p441_p9)
}
  0x18   :  { %46 = dma.hbm_to_vmem [thread:$0]  %s556_s5, 512, %s41_s9, [#allocation6], %s472_s27, %s472_s27, %s473_s28  }
  0x19   :  { %465 = dma.done.wait [#allocation3], 512  }
  0x1a   :  { %466 = vsyncadd [#allocation3], 4294966784 }
  0x1b   :  { %467 = dma.done.wait [#allocation6], 512  }
  0x1c   :  { %468 = vsyncadd [#allocation6], 4294966784  ;;  %v475_v0 = vmov 0   ;;  %v55_v1 = vld [vmem:[%s551_s0] sm:$0xff]  ;;  %v56_v2 = vlaneseq  ;;  %vm68_vm0 = vcmask 64512   ;;  %v476_v15 = vmov 0.0  }
  0x1d   :  { %404 = vset.pattern.permute.xlu0 %v475_v0  ;;  %v350_v4 = vld [vmem:[%s552_s1] ss:$0 sm:$0xff]  ;;  %369 = vmatprep.subr.mxu0 %v476_v15  ;;  %vm477_vm3 = vmmov 0   ;;  %v166_v16 = vld [vmem:[#allocation2 + $0x18] sm:$0xff]  ;;  %v165_v17 = vld [vmem:[#allocation2 + $0x10] sm:$0xff]  ;;  %vm174_vm6 = vcmask 261120  }
  0x1e   :  { %60 = vperm.xlu0 %404, %v55_v1   ;;  %v57_v3 = vand.u32 127, %v56_v2  ;;  %v89_v14 = vld [vmem:[%s553_s2] sm:$0xff]  ;;  %371 = vmatprep.mubr.msk.f32.mxu0 %vm477_vm3, %v476_v15  ;;  %v164_v18 = vld [vmem:[#allocation2 + $0x8] sm:$0xff]  ;;  %v252_v27 = vld [vmem:[#allocation5 + $0x18] sm:$0xff]  ;;  %s478_s18 = smov [#allocation7]  }
  0x1f   :  { %370 = vmatpush3.msra.mxu0 %v89_v14  ;;  %374 = vmatprep.subr.mxu1 %v476_v15  ;;  %v163_v26 = vld [vmem:[#allocation2] sm:$0xff]  ;;  %v251_v30 = vld [vmem:[#allocation5 + $0x10] sm:$0xff]  ;;  %v250_v31 = vld [vmem:[#allocation5 + $0x8] sm:$0xff]  ;;  %s340_s19 = sshll.u32 %s478_s18, 4  ;;  %s341_s19 = int_to_ptr.vmem [resolvable:$true] %s340_s19 }
  0x20   :  { %382 = vmatprep.mubr.msk.f32.mxu1 %vm477_vm3, %v476_v15  ;;  %385 = vmatprep.subr.mxu0 %v476_v15  ;;  %v249_v32 = vld [vmem:[#allocation5] sm:$0xff]  ;;  %s445_s20 = scalar_lea.vmem %s341_s19, 128  ;;  %p450_p11 = scmp.lt.s32.totalorder %s341_s19, %s341_s19 }
  0x21   :  { %375 = vmatpush3.msra.mxu1 %v166_v16  ;;  %v353_v33 = vld [vmem:[%s555_s4] ss:$0 sm:$0xff]  ;;  %p446_p10 = scmp.ne.s32.totalorder %s341_s19, %s445_s20  ;;  %p451_p12 = scmp.lt.s32.totalorder %s445_s20, %s445_s20 }
  0x22   :  { %376 = vmatprep.subr.mxu1 %v476_v15  ;;  %v355_v38 = vld [vmem:[%s557_s6] ss:$0 sm:$0xff] }
  0x23   :  { %377 = vmatpush3.msra.mxu1 %v165_v17  ;;  %p452_p13 = por %p451_p12, %p450_p11 }
  0x24   :  { %378 = vmatprep.subr.mxu1 %v476_v15 }
  0x25   :  { %379 = vmatpush3.msra.mxu1 %v164_v18  ;;  %p453_p0 = pnand %p452_p13, %p446_p10 }
  0x26   :  { %380 = vmatprep.subr.mxu1 %v476_v15 }
  0x27   :  { %381 = vmatpush3.msra.mxu1 %v163_v26 }
  0x99   :  { %v61_v5 = vpop.permute.xlu0 %60 }
  0x9a   :  { %vm66_vm1 = vcmp.eq.s32.totalorder %v61_v5, %v350_v4 }
  0x9b   :  { %v67_v6 = vsel %vm66_vm1, %v57_v3, 8 }
  0x9c   :  { %v69_v7 = vsel %vm68_vm0, %v67_v6, 2147483647 }
  0x9d   :  { %v71_v8 = vshra.s32 %v69_v7, 16  ;;  %v70_v10 = vand.u32 65535, %v69_v7 }
  0x9f   :  { %v73_v9 = vcvt.s32.f32 %v71_v8  ;;  %v72_v12 = vcvt.s32.f32 %v70_v10 }
  0xa1   :  { %74 = vmin.xlane.f32.xlu0 %v73_v9 }
 0x12a   :  { %v75_v11 = vpop.xlane.xlu0 %74 }
 0x12b   :  { %vm76_vm2 = vcmp.eq.f32.partialorder %v73_v9, %v75_v11  ;;  %v81_v19 = vcvt.f32.s32 %v75_v11 }
 0x12c   :  { %v77_v13 = vsel %vm76_vm2, %v72_v12, inf }
 0x12d   :  { %78 = vmin.xlane.f32.xlu1 %v77_v13  ;;  %v82_v21 = vshll.u32 %v81_v19, 16 }
 0x1b6   :  { %v79_v20 = vpop.xlane.xlu1 %78 }
 0x1b7   :  { %v80_v22 = vcvt.f32.s32 %v79_v20 }
 0x1b9   :  { %v83_v23 = vadd.s32 %v82_v21, %v80_v22 }
 0x1bb   :  { %vm84_vm4 = vcmp.eq.s32.totalorder %v83_v23, 8 }
 0x1bc   :  { %v85_v24 = vsel %vm84_vm4, 0, %v83_v23 }
 0x1bd   :  { %vm86_vm5 = vcmp.eq.s32.totalorder %v85_v24, %v57_v3 }
 0x1be   :  { %v351_v25 = vsel %vm86_vm5, 1.0, %v476_v15 }
 0x1bf   :  { %372 = vmatmul.mubr.msk.f32.vlgmr.msra.gmra.mxu0 %vm68_vm0, %v351_v25 }
 0x1c0   :  { %393 = vmatprep.mubr.msk.f32.mxu0 %vm477_vm3, %v476_v15  ;;  %386 = vmatpush3.msra.mxu0 %v252_v27 }
 0x1c1   :  { %387 = vmatprep.subr.mxu0 %v476_v15 }
 0x1c2   :  { %388 = vmatpush3.msra.mxu0 %v251_v30 }
 0x1c3   :  { %389 = vmatprep.subr.mxu0 %v476_v15 }
 0x1c4   :  { %390 = vmatpush3.msra.mxu0 %v250_v31 }
 0x1c5   :  { %391 = vmatprep.subr.mxu0 %v476_v15 }
 0x1c6   :  { %392 = vmatpush3.msra.mxu0 %v249_v32 }
 0x27f   :  { %v159_v28 = vpop.f32.mrf.mxu0 }
 0x280   :  { %383 = vmatmul.mubr.msk.f32.vlgmr.msra.gmra.mxu1 %vm174_vm6, %v159_v28 }
 0x281   :  { %v373_v29 = vpop.f32.mrf.mxu0 }
 0x340   :  { %v244_v34 = vpop.f32.mrf.mxu1 }
 0x341   :  { %v245_v35 = vadd.f32 %v353_v33, %v244_v34 }
 0x342   :  { %v384_v36 = vpop.f32.mrf.mxu1 }
 0x343   :  { %v248_v37 = vmax.f32 %v245_v35, 0.0 }
 0x345   :  { %394 = vmatmul.mubr.msk.f32.vlgmr.msra.gmra.mxu0 %vm174_vm6, %v248_v37 }
 0x405   :  { %v329_v39 = vpop.f32.mrf.mxu0 }
 0x406   :  { %v330_v40 = vadd.f32 %v355_v38, %v329_v39 }
 0x407   :  { %v395_v41 = vpop.f32.mrf.mxu0 }
 0x408   :  { %333 = vst.msk [vmem:[#allocation7] sm:$0xff] %vm174_vm6, %v330_v40 }
 0x409   :  { %456 = shalt.err (!%p453_p0)
}
 0x40a   :  { %343 = dma.vmem_to_hbm [thread:$0]  %s341_s19, 128, %s558_s7, [#allocation4]  }
 0x40b   :  { %469 = dma.done.wait [#allocation4], 128  }
 0x40c   :  { %470 = vsyncadd [#allocation4], 4294967168 }
 0x40d   :  { %347 = vsyncpa [#allocation3], 1 }
 0x40e   :  { %348 = vsyncpa [#allocation6], 1 }
 0x40f   :  { %349 = vsyncpa [#allocation4], 1 }

</bundles_post_ra>
